<compile_context>
chip_gen: v5e
topology: v5e:2x2
jax: 0.10.0
libtpu: 0.0.40
codegen_flags: <defaults>
</compile_context>

<pallas_src>
import functools

import jax
import jax.numpy as jnp
from jax.experimental import pallas as pl
from jax.experimental.pallas import tpu as pltpu


def _resnet1d_fused_kernel(x_ref, w1_ref, b1_ref, w2_ref, b2_ref, o_ref, *, dilations):
    """All ResConv1DBlocks fused; one batch tile per grid step.

    x_ref : (bt, C, T)         input slab (f32)
    w1_ref: (depth, 3, C, C)   conv1 weights, taps stacked on axis 1 (w1_ref[l, k] = W1_l[:, :, k])
    b1_ref: (depth, C, 1)      conv1 bias
    w2_ref: (depth, C, C)      conv2 (1x1) weights (w2_ref[l] = W2_l[:, :, 0])
    b2_ref: (depth, C, 1)      conv2 bias
    o_ref : (bt, C, T)         output slab
    """
    bt, C, T = x_ref.shape

    # Hoisted out of all loops: lane-index iota and per-layer shift masks
    # (JAX does not CSE broadcast_in_dim, so build them exactly once).
    lane = jax.lax.broadcasted_iota(jnp.int32, (C, T), 1)
    layer_masks = [(d, lane >= d, lane < (T - d)) for d in dilations]

    for b in range(bt):                                   # static unroll over batch tile
        x = x_ref[b].astype(jnp.float32)                  # (C, T)

        for l, (d, left_valid, right_valid) in enumerate(layer_masks):   # static unroll over depth
            # activation1 (ReLU); norm is Identity.
            h = jnp.maximum(x, 0.0)

            # Shifted taps via lane rotation (XLU) + mask select (VPU); no concat copies.
            #   h_prev[t] = h[t - d]  (zero for t < d)
            #   h_next[t] = h[t + d]  (zero for t >= T - d)
            h_prev = jnp.where(left_valid, pltpu.roll(h, d, axis=1), 0.0)
            h_next = jnp.where(right_valid, pltpu.roll(h, T - d, axis=1), 0.0)

            # conv1 (k=3, dilation=d, padding=d): three accumulated K=C MXU dots,
            # bias as a broadcast VPU add (hides under the MXU).
            y1 = jnp.dot(w1_ref[l, 0], h_prev, preferred_element_type=jnp.float32)
            y1 = y1 + jnp.dot(w1_ref[l, 1], h, preferred_element_type=jnp.float32)
            y1 = y1 + jnp.dot(w1_ref[l, 2], h_next, preferred_element_type=jnp.float32)
            y1 = y1 + b1_ref[l]                            # (C,1) broadcast over T

            # activation2 (ReLU); norm is Identity.
            h2 = jnp.maximum(y1, 0.0)

            # conv2 (1x1) + bias.
            y2 = jnp.dot(w2_ref[l], h2, preferred_element_type=jnp.float32) + b2_ref[l]

            # residual
            x = y2 + x

        o_ref[b] = x.astype(o_ref.dtype)


def _default_batch_tiles(B):
    """1 grid program on single-TC chips (v5e/v6e); 2 'parallel' programs on v7x (2 TCs)."""
    try:
        kind = jax.devices()[0].device_kind.lower()
    except Exception:
        kind = ""
    two_tc = ("v7" in kind) or ("7x" in kind)
    if two_tc and B % 2 == 0:
        return 2
    return 1


def resnet1d_forward(x, params, dilations, *, batch_tiles=None):
    """Resnet1D forward: all ResConv1DBlocks fused in a single pallas_call.

    x: (B, C, T); params: list of (w1 (C,C,3), b1 (C,), w2 (C,C,1), b2 (C,));
    dilations: per-layer dilation (already reversed if reverse_dilation).
    """
    B, C, T = x.shape
    depth = len(params)
    assert depth == len(dilations)
    dils = tuple(int(d) for d in dilations)
    assert all(1 <= d < T for d in dils), "each dilation must satisfy 1 <= d < T"

    if batch_tiles is None:
        batch_tiles = _default_batch_tiles(B)
    assert B % batch_tiles == 0
    bt = B // batch_tiles

    # Pack weights in the wrapper: taps stacked on their own axis, biases as (depth, C, 1)
    # (no ones-row / K-augmentation; K stays an exact multiple of the sublane group).
    w1_all = jnp.stack([jnp.moveaxis(w1, -1, 0) for (w1, _b1, _w2, _b2) in params], axis=0)   # (depth,3,C,C)
    b1_all = jnp.stack([b1[:, None] for (_w1, b1, _w2, _b2) in params], axis=0)               # (depth,C,1)
    w2_all = jnp.stack([w2[:, :, 0] for (_w1, _b1, w2, _b2) in params], axis=0)               # (depth,C,C)
    b2_all = jnp.stack([b2[:, None] for (_w1, _b1, _w2, b2) in params], axis=0)               # (depth,C,1)

    kernel = functools.partial(_resnet1d_fused_kernel, dilations=dils)

    # TODO(synk): for production sizes (C in the hundreds, long T): tile T with a
    # per-layer dilation halo, move depth onto an "arbitrary" grid axis (weights
    # indexed by the depth coordinate, residual carried in the output block),
    # single-buffer the grid-invariant weight blocks (pipeline_mode=pl.Buffered(1)),
    # set vmem_limit_bytes (v7x has only 64 MiB VMEM), and optionally cast to bf16
    # for the MXU. At these shapes the full slab + all weights fit VMEM trivially.
    return pl.pallas_call(
        kernel,
        out_shape=jax.ShapeDtypeStruct((B, C, T), x.dtype),
        grid_spec=pltpu.PrefetchScalarGridSpec(
            num_scalar_prefetch=0,
            grid=(batch_tiles,),
            in_specs=[
                pl.BlockSpec((bt, C, T), lambda i: (i, 0, 0)),
                pl.BlockSpec((depth, 3, C, C), lambda i: (0, 0, 0, 0)),
                pl.BlockSpec((depth, C, 1), lambda i: (0, 0, 0)),
                pl.BlockSpec((depth, C, C), lambda i: (0, 0, 0)),
                pl.BlockSpec((depth, C, 1), lambda i: (0, 0, 0)),
            ],
            out_specs=pl.BlockSpec((bt, C, T), lambda i: (i, 0, 0)),
        ),
        compiler_params=pltpu.CompilerParams(
            dimension_semantics=("parallel",)),
    )(x, w1_all, b1_all, w2_all, b2_all)


# ---------------- pure-JAX reference (for verification) ----------------
def _ref_block(x, w1, b1, w2, b2, dilation):
    B, C, T = x.shape
    h = jnp.maximum(x, 0.0)
    hp = jnp.pad(h, ((0, 0), (0, 0), (dilation, dilation)))
    out1 = jnp.zeros((B, w1.shape[0], T), jnp.float32)
    for k in range(3):
        out1 = out1 + jnp.einsum(
            "oc,bct->bot", w1[:, :, k], hp[:, :, k * dilation: k * dilation + T])
    out1 = out1 + b1[None, :, None]
    h2 = jnp.maximum(out1, 0.0)
    out2 = jnp.einsum("oc,bct->bot", w2[:, :, 0], h2) + b2[None, :, None]
    return out2 + x


def _ref_resnet(x, params, dilations):
    for (w1, b1, w2, b2), d in zip(params, dilations):
        x = _ref_block(x, w1, b1, w2, b2, d)
    return x


# ---------------- parameter init (deterministic, PyTorch-style uniform) --------
def init_params(key, n_in, n_depth):
    params = []
    for _ in range(n_depth):
        key, k1, k2, k3, k4 = jax.random.split(key, 5)
        bound1 = 1.0 / (n_in * 3) ** 0.5
        bound2 = 1.0 / (n_in * 1) ** 0.5
        w1 = jax.random.uniform(k1, (n_in, n_in, 3), jnp.float32, -bound1, bound1)
        b1 = jax.random.uniform(k2, (n_in,), jnp.float32, -bound1, bound1)
        w2 = jax.random.uniform(k3, (n_in, n_in, 1), jnp.float32, -bound2, bound2)
        b2 = jax.random.uniform(k4, (n_in,), jnp.float32, -bound2, bound2)
        params.append((w1, b1, w2, b2))
    return params


if __name__ == "__main__":
    # Resnet1D(n_in=16, n_depth=3, dilation_growth_rate=2, reverse_dilation=True,
    #          activation='relu', norm=None)
    B, C, T = 2, 16, 128
    n_depth = 3
    dilation_growth_rate = 2
    reverse_dilation = True

    dilations = [dilation_growth_rate ** d for d in range(n_depth)]
    if reverse_dilation:
        dilations = dilations[::-1]

    key = jax.random.PRNGKey(0)
    key, kx = jax.random.split(key)
    x = jax.random.normal(kx, (B, C, T), jnp.float32)
    params = init_params(key, C, n_depth)

    out = resnet1d_forward(x, params, dilations)
    out = jax.block_until_ready(out)

    ref = _ref_resnet(x, params, dilations)
    assert out.shape == (B, C, T)
    assert jnp.allclose(out, ref, atol=1e-4, rtol=1e-4), "mismatch vs reference"

    print("KERNEL_OK")
</pallas_src>

<mosaic_0001>
module attributes {stable_mosaic.version = 11 : i64} {
  func.func @_resnet1d_fused_kernel(%arg0: i32, %arg1: memref<2x16x128xf32, #tpu.memory_space<vmem>>, %arg2: memref<3x3x16x16xf32, #tpu.memory_space<vmem>>, %arg3: memref<3x16x1xf32, #tpu.memory_space<vmem>>, %arg4: memref<3x16x16xf32, #tpu.memory_space<vmem>>, %arg5: memref<3x16x1xf32, #tpu.memory_space<vmem>>, %arg6: memref<2x16x128xf32, #tpu.memory_space<vmem>>) attributes {dimension_semantics = [#tpu.dimension_semantics<parallel>], iteration_bounds = array<i64: 1>, scalar_prefetch = 0 : i64, scratch_operands = 0 : i64, tpu.core_type = #tpu.core_type<tc>, window_params = [{transform_indices = @transform_0, window_bounds = array<i64: 2, 16, 128>}, {pipeline_mode = #tpu.pipeline_mode<synchronous>, transform_indices = @transform_1, window_bounds = array<i64: 3, 3, 16, 16>}, {pipeline_mode = #tpu.pipeline_mode<synchronous>, transform_indices = @transform_2, window_bounds = array<i64: 3, 16, 1>}, {pipeline_mode = #tpu.pipeline_mode<synchronous>, transform_indices = @transform_3, window_bounds = array<i64: 3, 16, 16>}, {pipeline_mode = #tpu.pipeline_mode<synchronous>, transform_indices = @transform_4, window_bounds = array<i64: 3, 16, 1>}, {transform_indices = @transform_5, window_bounds = array<i64: 2, 16, 128>}]} {
    %0 = tpu.iota {dimensions = array<i32: 1>} : vector<16x128xi32>
    %c4_i32 = arith.constant 4 : i32
    %1 = vector.broadcast %c4_i32 : i32 to vector<16x128xi32>
    %2 = arith.cmpi sge, %0, %1 : vector<16x128xi32>
    %c124_i32 = arith.constant 124 : i32
    %3 = vector.broadcast %c124_i32 : i32 to vector<16x128xi32>
    %4 = arith.cmpi slt, %0, %3 : vector<16x128xi32>
    %c2_i32 = arith.constant 2 : i32
    %5 = vector.broadcast %c2_i32 : i32 to vector<16x128xi32>
    %6 = arith.cmpi sge, %0, %5 : vector<16x128xi32>
    %c126_i32 = arith.constant 126 : i32
    %7 = vector.broadcast %c126_i32 : i32 to vector<16x128xi32>
    %8 = arith.cmpi slt, %0, %7 : vector<16x128xi32>
    %c1_i32 = arith.constant 1 : i32
    %9 = vector.broadcast %c1_i32 : i32 to vector<16x128xi32>
    %10 = arith.cmpi sge, %0, %9 : vector<16x128xi32>
    %c127_i32 = arith.constant 127 : i32
    %11 = vector.broadcast %c127_i32 : i32 to vector<16x128xi32>
    %12 = arith.cmpi slt, %0, %11 : vector<16x128xi32>
    %c0 = arith.constant 0 : index
    %c0_0 = arith.constant 0 : index
    %c0_1 = arith.constant 0 : index
    %13 = vector.load %arg1[%c0, %c0_0, %c0_1] : memref<2x16x128xf32, #tpu.memory_space<vmem>>, vector<1x16x128xf32>
    %14 = vector.shape_cast %13 : vector<1x16x128xf32> to vector<16x128xf32>
    %cst = arith.constant 0.000000e+00 : f32
    %15 = vector.broadcast %cst : f32 to vector<16x128xf32>
    %16 = arith.maximumf %14, %15 : vector<16x128xf32>
    %c4_i32_2 = arith.constant 4 : i32
    %17 = tpu.dynamic_rotate %16 by %c4_i32_2 dim 1 : vector<16x128xf32>, i32 -> vector<16x128xf32>
    %cst_3 = arith.constant 0.000000e+00 : f32
    %18 = vector.broadcast %cst_3 : f32 to vector<16x128xf32>
    %19 = arith.select %2, %17, %18 : vector<16x128xi1>, vector<16x128xf32>
    %c124_i32_4 = arith.constant 124 : i32
    %20 = tpu.dynamic_rotate %16 by %c124_i32_4 dim 1 : vector<16x128xf32>, i32 -> vector<16x128xf32>
    %cst_5 = arith.constant 0.000000e+00 : f32
    %21 = vector.broadcast %cst_5 : f32 to vector<16x128xf32>
    %22 = arith.select %4, %20, %21 : vector<16x128xi1>, vector<16x128xf32>
    %c0_6 = arith.constant 0 : index
    %c0_7 = arith.constant 0 : index
    %c0_8 = arith.constant 0 : index
    %c0_9 = arith.constant 0 : index
    %23 = vector.load %arg2[%c0_6, %c0_7, %c0_8, %c0_9] : memref<3x3x16x16xf32, #tpu.memory_space<vmem>>, vector<1x1x16x16xf32>
    %24 = vector.shape_cast %23 : vector<1x1x16x16xf32> to vector<16x16xf32>
    %cst_10 = arith.constant dense<0.000000e+00> : vector<16x128xf32>
    %25 = tpu.matmul %24, %19, %cst_10 {dimension_numbers = #tpu.dot_dimension_numbers<[1], [0], [0], [1], [0, 0, 1, 1], [], []>} : vector<16x16xf32>, vector<16x128xf32>, vector<16x128xf32> -> vector<16x128xf32>
    %c0_11 = arith.constant 0 : index
    %c1 = arith.constant 1 : index
    %c0_12 = arith.constant 0 : index
    %c0_13 = arith.constant 0 : index
    %26 = vector.load %arg2[%c0_11, %c1, %c0_12, %c0_13] : memref<3x3x16x16xf32, #tpu.memory_space<vmem>>, vector<1x1x16x16xf32>
    %27 = vector.shape_cast %26 : vector<1x1x16x16xf32> to vector<16x16xf32>
    %cst_14 = arith.constant dense<0.000000e+00> : vector<16x128xf32>
    %28 = tpu.matmul %27, %16, %cst_14 {dimension_numbers = #tpu.dot_dimension_numbers<[1], [0], [0], [1], [0, 0, 1, 1], [], []>} : vector<16x16xf32>, vector<16x128xf32>, vector<16x128xf32> -> vector<16x128xf32>
    %29 = arith.addf %25, %28 : vector<16x128xf32>
    %c0_15 = arith.constant 0 : index
    %c2 = arith.constant 2 : index
    %c0_16 = arith.constant 0 : index
    %c0_17 = arith.constant 0 : index
    %30 = vector.load %arg2[%c0_15, %c2, %c0_16, %c0_17] : memref<3x3x16x16xf32, #tpu.memory_space<vmem>>, vector<1x1x16x16xf32>
    %31 = vector.shape_cast %30 : vector<1x1x16x16xf32> to vector<16x16xf32>
    %cst_18 = arith.constant dense<0.000000e+00> : vector<16x128xf32>
    %32 = tpu.matmul %31, %22, %cst_18 {dimension_numbers = #tpu.dot_dimension_numbers<[1], [0], [0], [1], [0, 0, 1, 1], [], []>} : vector<16x16xf32>, vector<16x128xf32>, vector<16x128xf32> -> vector<16x128xf32>
    %33 = arith.addf %29, %32 : vector<16x128xf32>
    %c0_19 = arith.constant 0 : index
    %c0_20 = arith.constant 0 : index
    %c0_21 = arith.constant 0 : index
    %34 = vector.load %arg3[%c0_19, %c0_20, %c0_21] : memref<3x16x1xf32, #tpu.memory_space<vmem>>, vector<1x16x1xf32>
    %35 = vector.shape_cast %34 : vector<1x16x1xf32> to vector<16x1xf32>
    %36 = vector.broadcast %35 : vector<16x1xf32> to vector<16x128xf32>
    %37 = arith.addf %33, %36 : vector<16x128xf32>
    %cst_22 = arith.constant 0.000000e+00 : f32
    %38 = vector.broadcast %cst_22 : f32 to vector<16x128xf32>
    %39 = arith.maximumf %37, %38 : vector<16x128xf32>
    %c0_23 = arith.constant 0 : index
    %c0_24 = arith.constant 0 : index
    %c0_25 = arith.constant 0 : index
    %40 = vector.load %arg4[%c0_23, %c0_24, %c0_25] : memref<3x16x16xf32, #tpu.memory_space<vmem>>, vector<1x16x16xf32>
    %41 = vector.shape_cast %40 : vector<1x16x16xf32> to vector<16x16xf32>
    %cst_26 = arith.constant dense<0.000000e+00> : vector<16x128xf32>
    %42 = tpu.matmul %41, %39, %cst_26 {dimension_numbers = #tpu.dot_dimension_numbers<[1], [0], [0], [1], [0, 0, 1, 1], [], []>} : vector<16x16xf32>, vector<16x128xf32>, vector<16x128xf32> -> vector<16x128xf32>
    %c0_27 = arith.constant 0 : index
    %c0_28 = arith.constant 0 : index
    %c0_29 = arith.constant 0 : index
    %43 = vector.load %arg5[%c0_27, %c0_28, %c0_29] : memref<3x16x1xf32, #tpu.memory_space<vmem>>, vector<1x16x1xf32>
    %44 = vector.shape_cast %43 : vector<1x16x1xf32> to vector<16x1xf32>
    %45 = vector.broadcast %44 : vector<16x1xf32> to vector<16x128xf32>
    %46 = arith.addf %42, %45 : vector<16x128xf32>
    %47 = arith.addf %46, %14 : vector<16x128xf32>
    %cst_30 = arith.constant 0.000000e+00 : f32
    %48 = vector.broadcast %cst_30 : f32 to vector<16x128xf32>
    %49 = arith.maximumf %47, %48 : vector<16x128xf32>
    %c2_i32_31 = arith.constant 2 : i32
    %50 = tpu.dynamic_rotate %49 by %c2_i32_31 dim 1 : vector<16x128xf32>, i32 -> vector<16x128xf32>
    %cst_32 = arith.constant 0.000000e+00 : f32
    %51 = vector.broadcast %cst_32 : f32 to vector<16x128xf32>
    %52 = arith.select %6, %50, %51 : vector<16x128xi1>, vector<16x128xf32>
    %c126_i32_33 = arith.constant 126 : i32
    %53 = tpu.dynamic_rotate %49 by %c126_i32_33 dim 1 : vector<16x128xf32>, i32 -> vector<16x128xf32>
    %cst_34 = arith.constant 0.000000e+00 : f32
    %54 = vector.broadcast %cst_34 : f32 to vector<16x128xf32>
    %55 = arith.select %8, %53, %54 : vector<16x128xi1>, vector<16x128xf32>
    %c1_35 = arith.constant 1 : index
    %c0_36 = arith.constant 0 : index
    %c0_37 = arith.constant 0 : index
    %c0_38 = arith.constant 0 : index
    %56 = vector.load %arg2[%c1_35, %c0_36, %c0_37, %c0_38] : memref<3x3x16x16xf32, #tpu.memory_space<vmem>>, vector<1x1x16x16xf32>
    %57 = vector.shape_cast %56 : vector<1x1x16x16xf32> to vector<16x16xf32>
    %cst_39 = arith.constant dense<0.000000e+00> : vector<16x128xf32>
    %58 = tpu.matmul %57, %52, %cst_39 {dimension_numbers = #tpu.dot_dimension_numbers<[1], [0], [0], [1], [0, 0, 1, 1], [], []>} : vector<16x16xf32>, vector<16x128xf32>, vector<16x128xf32> -> vector<16x128xf32>
    %c1_40 = arith.constant 1 : index
    %c1_41 = arith.constant 1 : index
    %c0_42 = arith.constant 0 : index
    %c0_43 = arith.constant 0 : index
    %59 = vector.load %arg2[%c1_40, %c1_41, %c0_42, %c0_43] : memref<3x3x16x16xf32, #tpu.memory_space<vmem>>, vector<1x1x16x16xf32>
    %60 = vector.shape_cast %59 : vector<1x1x16x16xf32> to vector<16x16xf32>
    %cst_44 = arith.constant dense<0.000000e+00> : vector<16x128xf32>
    %61 = tpu.matmul %60, %49, %cst_44 {dimension_numbers = #tpu.dot_dimension_numbers<[1], [0], [0], [1], [0, 0, 1, 1], [], []>} : vector<16x16xf32>, vector<16x128xf32>, vector<16x128xf32> -> vector<16x128xf32>
    %62 = arith.addf %58, %61 : vector<16x128xf32>
    %c1_45 = arith.constant 1 : index
    %c2_46 = arith.constant 2 : index
    %c0_47 = arith.constant 0 : index
    %c0_48 = arith.constant 0 : index
    %63 = vector.load %arg2[%c1_45, %c2_46, %c0_47, %c0_48] : memref<3x3x16x16xf32, #tpu.memory_space<vmem>>, vector<1x1x16x16xf32>
    %64 = vector.shape_cast %63 : vector<1x1x16x16xf32> to vector<16x16xf32>
    %cst_49 = arith.constant dense<0.000000e+00> : vector<16x128xf32>
    %65 = tpu.matmul %64, %55, %cst_49 {dimension_numbers = #tpu.dot_dimension_numbers<[1], [0], [0], [1], [0, 0, 1, 1], [], []>} : vector<16x16xf32>, vector<16x128xf32>, vector<16x128xf32> -> vector<16x128xf32>
    %66 = arith.addf %62, %65 : vector<16x128xf32>
    %c1_50 = arith.constant 1 : index
    %c0_51 = arith.constant 0 : index
    %c0_52 = arith.constant 0 : index
    %67 = vector.load %arg3[%c1_50, %c0_51, %c0_52] : memref<3x16x1xf32, #tpu.memory_space<vmem>>, vector<1x16x1xf32>
    %68 = vector.shape_cast %67 : vector<1x16x1xf32> to vector<16x1xf32>
    %69 = vector.broadcast %68 : vector<16x1xf32> to vector<16x128xf32>
    %70 = arith.addf %66, %69 : vector<16x128xf32>
    %cst_53 = arith.constant 0.000000e+00 : f32
    %71 = vector.broadcast %cst_53 : f32 to vector<16x128xf32>
    %72 = arith.maximumf %70, %71 : vector<16x128xf32>
    %c1_54 = arith.constant 1 : index
    %c0_55 = arith.constant 0 : index
    %c0_56 = arith.constant 0 : index
    %73 = vector.load %arg4[%c1_54, %c0_55, %c0_56] : memref<3x16x16xf32, #tpu.memory_space<vmem>>, vector<1x16x16xf32>
    %74 = vector.shape_cast %73 : vector<1x16x16xf32> to vector<16x16xf32>
    %cst_57 = arith.constant dense<0.000000e+00> : vector<16x128xf32>
    %75 = tpu.matmul %74, %72, %cst_57 {dimension_numbers = #tpu.dot_dimension_numbers<[1], [0], [0], [1], [0, 0, 1, 1], [], []>} : vector<16x16xf32>, vector<16x128xf32>, vector<16x128xf32> -> vector<16x128xf32>
    %c1_58 = arith.constant 1 : index
    %c0_59 = arith.constant 0 : index
    %c0_60 = arith.constant 0 : index
    %76 = vector.load %arg5[%c1_58, %c0_59, %c0_60] : memref<3x16x1xf32, #tpu.memory_space<vmem>>, vector<1x16x1xf32>
    %77 = vector.shape_cast %76 : vector<1x16x1xf32> to vector<16x1xf32>
    %78 = vector.broadcast %77 : vector<16x1xf32> to vector<16x128xf32>
    %79 = arith.addf %75, %78 : vector<16x128xf32>
    %80 = arith.addf %79, %47 : vector<16x128xf32>
    %cst_61 = arith.constant 0.000000e+00 : f32
    %81 = vector.broadcast %cst_61 : f32 to vector<16x128xf32>
    %82 = arith.maximumf %80, %81 : vector<16x128xf32>
    %c1_i32_62 = arith.constant 1 : i32
    %83 = tpu.dynamic_rotate %82 by %c1_i32_62 dim 1 : vector<16x128xf32>, i32 -> vector<16x128xf32>
    %cst_63 = arith.constant 0.000000e+00 : f32
    %84 = vector.broadcast %cst_63 : f32 to vector<16x128xf32>
    %85 = arith.select %10, %83, %84 : vector<16x128xi1>, vector<16x128xf32>
    %c127_i32_64 = arith.constant 127 : i32
    %86 = tpu.dynamic_rotate %82 by %c127_i32_64 dim 1 : vector<16x128xf32>, i32 -> vector<16x128xf32>
    %cst_65 = arith.constant 0.000000e+00 : f32
    %87 = vector.broadcast %cst_65 : f32 to vector<16x128xf32>
    %88 = arith.select %12, %86, %87 : vector<16x128xi1>, vector<16x128xf32>
    %c2_66 = arith.constant 2 : index
    %c0_67 = arith.constant 0 : index
    %c0_68 = arith.constant 0 : index
    %c0_69 = arith.constant 0 : index
    %89 = vector.load %arg2[%c2_66, %c0_67, %c0_68, %c0_69] : memref<3x3x16x16xf32, #tpu.memory_space<vmem>>, vector<1x1x16x16xf32>
    %90 = vector.shape_cast %89 : vector<1x1x16x16xf32> to vector<16x16xf32>
    %cst_70 = arith.constant dense<0.000000e+00> : vector<16x128xf32>
    %91 = tpu.matmul %90, %85, %cst_70 {dimension_numbers = #tpu.dot_dimension_numbers<[1], [0], [0], [1], [0, 0, 1, 1], [], []>} : vector<16x16xf32>, vector<16x128xf32>, vector<16x128xf32> -> vector<16x128xf32>
    %c2_71 = arith.constant 2 : index
    %c1_72 = arith.constant 1 : index
    %c0_73 = arith.constant 0 : index
    %c0_74 = arith.constant 0 : index
    %92 = vector.load %arg2[%c2_71, %c1_72, %c0_73, %c0_74] : memref<3x3x16x16xf32, #tpu.memory_space<vmem>>, vector<1x1x16x16xf32>
    %93 = vector.shape_cast %92 : vector<1x1x16x16xf32> to vector<16x16xf32>
    %cst_75 = arith.constant dense<0.000000e+00> : vector<16x128xf32>
    %94 = tpu.matmul %93, %82, %cst_75 {dimension_numbers = #tpu.dot_dimension_numbers<[1], [0], [0], [1], [0, 0, 1, 1], [], []>} : vector<16x16xf32>, vector<16x128xf32>, vector<16x128xf32> -> vector<16x128xf32>
    %95 = arith.addf %91, %94 : vector<16x128xf32>
    %c2_76 = arith.constant 2 : index
    %c2_77 = arith.constant 2 : index
    %c0_78 = arith.constant 0 : index
    %c0_79 = arith.constant 0 : index
    %96 = vector.load %arg2[%c2_76, %c2_77, %c0_78, %c0_79] : memref<3x3x16x16xf32, #tpu.memory_space<vmem>>, vector<1x1x16x16xf32>
    %97 = vector.shape_cast %96 : vector<1x1x16x16xf32> to vector<16x16xf32>
    %cst_80 = arith.constant dense<0.000000e+00> : vector<16x128xf32>
    %98 = tpu.matmul %97, %88, %cst_80 {dimension_numbers = #tpu.dot_dimension_numbers<[1], [0], [0], [1], [0, 0, 1, 1], [], []>} : vector<16x16xf32>, vector<16x128xf32>, vector<16x128xf32> -> vector<16x128xf32>
    %99 = arith.addf %95, %98 : vector<16x128xf32>
    %c2_81 = arith.constant 2 : index
    %c0_82 = arith.constant 0 : index
    %c0_83 = arith.constant 0 : index
    %100 = vector.load %arg3[%c2_81, %c0_82, %c0_83] : memref<3x16x1xf32, #tpu.memory_space<vmem>>, vector<1x16x1xf32>
    %101 = vector.shape_cast %100 : vector<1x16x1xf32> to vector<16x1xf32>
    %102 = vector.broadcast %101 : vector<16x1xf32> to vector<16x128xf32>
    %103 = arith.addf %99, %102 : vector<16x128xf32>
    %cst_84 = arith.constant 0.000000e+00 : f32
    %104 = vector.broadcast %cst_84 : f32 to vector<16x128xf32>
    %105 = arith.maximumf %103, %104 : vector<16x128xf32>
    %c2_85 = arith.constant 2 : index
    %c0_86 = arith.constant 0 : index
    %c0_87 = arith.constant 0 : index
    %106 = vector.load %arg4[%c2_85, %c0_86, %c0_87] : memref<3x16x16xf32, #tpu.memory_space<vmem>>, vector<1x16x16xf32>
    %107 = vector.shape_cast %106 : vector<1x16x16xf32> to vector<16x16xf32>
    %cst_88 = arith.constant dense<0.000000e+00> : vector<16x128xf32>
    %108 = tpu.matmul %107, %105, %cst_88 {dimension_numbers = #tpu.dot_dimension_numbers<[1], [0], [0], [1], [0, 0, 1, 1], [], []>} : vector<16x16xf32>, vector<16x128xf32>, vector<16x128xf32> -> vector<16x128xf32>
    %c2_89 = arith.constant 2 : index
    %c0_90 = arith.constant 0 : index
    %c0_91 = arith.constant 0 : index
    %109 = vector.load %arg5[%c2_89, %c0_90, %c0_91] : memref<3x16x1xf32, #tpu.memory_space<vmem>>, vector<1x16x1xf32>
    %110 = vector.shape_cast %109 : vector<1x16x1xf32> to vector<16x1xf32>
    %111 = vector.broadcast %110 : vector<16x1xf32> to vector<16x128xf32>
    %112 = arith.addf %108, %111 : vector<16x128xf32>
    %113 = arith.addf %112, %80 : vector<16x128xf32>
    %c0_92 = arith.constant 0 : index
    %c0_93 = arith.constant 0 : index
    %c0_94 = arith.constant 0 : index
    %114 = vector.load %arg6[%c0_92, %c0_93, %c0_94] : memref<2x16x128xf32, #tpu.memory_space<vmem>>, vector<1x16x128xf32>
    %115 = vector.shape_cast %114 : vector<1x16x128xf32> to vector<16x128xf32>
    %116 = vector.shape_cast %113 : vector<16x128xf32> to vector<1x16x128xf32>
    tpu.vector_store %arg6[%c0_92, %c0_93, %c0_94], %116 {strides = array<i32>} : memref<2x16x128xf32, #tpu.memory_space<vmem>>, vector<1x16x128xf32>,
    %c1_95 = arith.constant 1 : index
    %c0_96 = arith.constant 0 : index
    %c0_97 = arith.constant 0 : index
    %117 = vector.load %arg1[%c1_95, %c0_96, %c0_97] : memref<2x16x128xf32, #tpu.memory_space<vmem>>, vector<1x16x128xf32>
    %118 = vector.shape_cast %117 : vector<1x16x128xf32> to vector<16x128xf32>
    %cst_98 = arith.constant 0.000000e+00 : f32
    %119 = vector.broadcast %cst_98 : f32 to vector<16x128xf32>
    %120 = arith.maximumf %118, %119 : vector<16x128xf32>
    %c4_i32_99 = arith.constant 4 : i32
    %121 = tpu.dynamic_rotate %120 by %c4_i32_99 dim 1 : vector<16x128xf32>, i32 -> vector<16x128xf32>
    %cst_100 = arith.constant 0.000000e+00 : f32
    %122 = vector.broadcast %cst_100 : f32 to vector<16x128xf32>
    %123 = arith.select %2, %121, %122 : vector<16x128xi1>, vector<16x128xf32>
    %c124_i32_101 = arith.constant 124 : i32
    %124 = tpu.dynamic_rotate %120 by %c124_i32_101 dim 1 : vector<16x128xf32>, i32 -> vector<16x128xf32>
    %cst_102 = arith.constant 0.000000e+00 : f32
    %125 = vector.broadcast %cst_102 : f32 to vector<16x128xf32>
    %126 = arith.select %4, %124, %125 : vector<16x128xi1>, vector<16x128xf32>
    %c0_103 = arith.constant 0 : index
    %c0_104 = arith.constant 0 : index
    %c0_105 = arith.constant 0 : index
    %c0_106 = arith.constant 0 : index
    %127 = vector.load %arg2[%c0_103, %c0_104, %c0_105, %c0_106] : memref<3x3x16x16xf32, #tpu.memory_space<vmem>>, vector<1x1x16x16xf32>
    %128 = vector.shape_cast %127 : vector<1x1x16x16xf32> to vector<16x16xf32>
    %cst_107 = arith.constant dense<0.000000e+00> : vector<16x128xf32>
    %129 = tpu.matmul %128, %123, %cst_107 {dimension_numbers = #tpu.dot_dimension_numbers<[1], [0], [0], [1], [0, 0, 1, 1], [], []>} : vector<16x16xf32>, vector<16x128xf32>, vector<16x128xf32> -> vector<16x128xf32>
    %c0_108 = arith.constant 0 : index
    %c1_109 = arith.constant 1 : index
    %c0_110 = arith.constant 0 : index
    %c0_111 = arith.constant 0 : index
    %130 = vector.load %arg2[%c0_108, %c1_109, %c0_110, %c0_111] : memref<3x3x16x16xf32, #tpu.memory_space<vmem>>, vector<1x1x16x16xf32>
    %131 = vector.shape_cast %130 : vector<1x1x16x16xf32> to vector<16x16xf32>
    %cst_112 = arith.constant dense<0.000000e+00> : vector<16x128xf32>
    %132 = tpu.matmul %131, %120, %cst_112 {dimension_numbers = #tpu.dot_dimension_numbers<[1], [0], [0], [1], [0, 0, 1, 1], [], []>} : vector<16x16xf32>, vector<16x128xf32>, vector<16x128xf32> -> vector<16x128xf32>
    %133 = arith.addf %129, %132 : vector<16x128xf32>
    %c0_113 = arith.constant 0 : index
    %c2_114 = arith.constant 2 : index
    %c0_115 = arith.constant 0 : index
    %c0_116 = arith.constant 0 : index
    %134 = vector.load %arg2[%c0_113, %c2_114, %c0_115, %c0_116] : memref<3x3x16x16xf32, #tpu.memory_space<vmem>>, vector<1x1x16x16xf32>
    %135 = vector.shape_cast %134 : vector<1x1x16x16xf32> to vector<16x16xf32>
    %cst_117 = arith.constant dense<0.000000e+00> : vector<16x128xf32>
    %136 = tpu.matmul %135, %126, %cst_117 {dimension_numbers = #tpu.dot_dimension_numbers<[1], [0], [0], [1], [0, 0, 1, 1], [], []>} : vector<16x16xf32>, vector<16x128xf32>, vector<16x128xf32> -> vector<16x128xf32>
    %137 = arith.addf %133, %136 : vector<16x128xf32>
    %c0_118 = arith.constant 0 : index
    %c0_119 = arith.constant 0 : index
    %c0_120 = arith.constant 0 : index
    %138 = vector.load %arg3[%c0_118, %c0_119, %c0_120] : memref<3x16x1xf32, #tpu.memory_space<vmem>>, vector<1x16x1xf32>
    %139 = vector.shape_cast %138 : vector<1x16x1xf32> to vector<16x1xf32>
    %140 = vector.broadcast %139 : vector<16x1xf32> to vector<16x128xf32>
    %141 = arith.addf %137, %140 : vector<16x128xf32>
    %cst_121 = arith.constant 0.000000e+00 : f32
    %142 = vector.broadcast %cst_121 : f32 to vector<16x128xf32>
    %143 = arith.maximumf %141, %142 : vector<16x128xf32>
    %c0_122 = arith.constant 0 : index
    %c0_123 = arith.constant 0 : index
    %c0_124 = arith.constant 0 : index
    %144 = vector.load %arg4[%c0_122, %c0_123, %c0_124] : memref<3x16x16xf32, #tpu.memory_space<vmem>>, vector<1x16x16xf32>
    %145 = vector.shape_cast %144 : vector<1x16x16xf32> to vector<16x16xf32>
    %cst_125 = arith.constant dense<0.000000e+00> : vector<16x128xf32>
    %146 = tpu.matmul %145, %143, %cst_125 {dimension_numbers = #tpu.dot_dimension_numbers<[1], [0], [0], [1], [0, 0, 1, 1], [], []>} : vector<16x16xf32>, vector<16x128xf32>, vector<16x128xf32> -> vector<16x128xf32>
    %c0_126 = arith.constant 0 : index
    %c0_127 = arith.constant 0 : index
    %c0_128 = arith.constant 0 : index
    %147 = vector.load %arg5[%c0_126, %c0_127, %c0_128] : memref<3x16x1xf32, #tpu.memory_space<vmem>>, vector<1x16x1xf32>
    %148 = vector.shape_cast %147 : vector<1x16x1xf32> to vector<16x1xf32>
    %149 = vector.broadcast %148 : vector<16x1xf32> to vector<16x128xf32>
    %150 = arith.addf %146, %149 : vector<16x128xf32>
    %151 = arith.addf %150, %118 : vector<16x128xf32>
    %cst_129 = arith.constant 0.000000e+00 : f32
    %152 = vector.broadcast %cst_129 : f32 to vector<16x128xf32>
    %153 = arith.maximumf %151, %152 : vector<16x128xf32>
    %c2_i32_130 = arith.constant 2 : i32
    %154 = tpu.dynamic_rotate %153 by %c2_i32_130 dim 1 : vector<16x128xf32>, i32 -> vector<16x128xf32>
    %cst_131 = arith.constant 0.000000e+00 : f32
    %155 = vector.broadcast %cst_131 : f32 to vector<16x128xf32>
    %156 = arith.select %6, %154, %155 : vector<16x128xi1>, vector<16x128xf32>
    %c126_i32_132 = arith.constant 126 : i32
    %157 = tpu.dynamic_rotate %153 by %c126_i32_132 dim 1 : vector<16x128xf32>, i32 -> vector<16x128xf32>
    %cst_133 = arith.constant 0.000000e+00 : f32
    %158 = vector.broadcast %cst_133 : f32 to vector<16x128xf32>
    %159 = arith.select %8, %157, %158 : vector<16x128xi1>, vector<16x128xf32>
    %c1_134 = arith.constant 1 : index
    %c0_135 = arith.constant 0 : index
    %c0_136 = arith.constant 0 : index
    %c0_137 = arith.constant 0 : index
    %160 = vector.load %arg2[%c1_134, %c0_135, %c0_136, %c0_137] : memref<3x3x16x16xf32, #tpu.memory_space<vmem>>, vector<1x1x16x16xf32>
    %161 = vector.shape_cast %160 : vector<1x1x16x16xf32> to vector<16x16xf32>
    %cst_138 = arith.constant dense<0.000000e+00> : vector<16x128xf32>
    %162 = tpu.matmul %161, %156, %cst_138 {dimension_numbers = #tpu.dot_dimension_numbers<[1], [0], [0], [1], [0, 0, 1, 1], [], []>} : vector<16x16xf32>, vector<16x128xf32>, vector<16x128xf32> -> vector<16x128xf32>
    %c1_139 = arith.constant 1 : index
    %c1_140 = arith.constant 1 : index
    %c0_141 = arith.constant 0 : index
    %c0_142 = arith.constant 0 : index
    %163 = vector.load %arg2[%c1_139, %c1_140, %c0_141, %c0_142] : memref<3x3x16x16xf32, #tpu.memory_space<vmem>>, vector<1x1x16x16xf32>
    %164 = vector.shape_cast %163 : vector<1x1x16x16xf32> to vector<16x16xf32>
    %cst_143 = arith.constant dense<0.000000e+00> : vector<16x128xf32>
    %165 = tpu.matmul %164, %153, %cst_143 {dimension_numbers = #tpu.dot_dimension_numbers<[1], [0], [0], [1], [0, 0, 1, 1], [], []>} : vector<16x16xf32>, vector<16x128xf32>, vector<16x128xf32> -> vector<16x128xf32>
    %166 = arith.addf %162, %165 : vector<16x128xf32>
    %c1_144 = arith.constant 1 : index
    %c2_145 = arith.constant 2 : index
    %c0_146 = arith.constant 0 : index
    %c0_147 = arith.constant 0 : index
    %167 = vector.load %arg2[%c1_144, %c2_145, %c0_146, %c0_147] : memref<3x3x16x16xf32, #tpu.memory_space<vmem>>, vector<1x1x16x16xf32>
    %168 = vector.shape_cast %167 : vector<1x1x16x16xf32> to vector<16x16xf32>
    %cst_148 = arith.constant dense<0.000000e+00> : vector<16x128xf32>
    %169 = tpu.matmul %168, %159, %cst_148 {dimension_numbers = #tpu.dot_dimension_numbers<[1], [0], [0], [1], [0, 0, 1, 1], [], []>} : vector<16x16xf32>, vector<16x128xf32>, vector<16x128xf32> -> vector<16x128xf32>
    %170 = arith.addf %166, %169 : vector<16x128xf32>
    %c1_149 = arith.constant 1 : index
    %c0_150 = arith.constant 0 : index
    %c0_151 = arith.constant 0 : index
    %171 = vector.load %arg3[%c1_149, %c0_150, %c0_151] : memref<3x16x1xf32, #tpu.memory_space<vmem>>, vector<1x16x1xf32>
    %172 = vector.shape_cast %171 : vector<1x16x1xf32> to vector<16x1xf32>
    %173 = vector.broadcast %172 : vector<16x1xf32> to vector<16x128xf32>
    %174 = arith.addf %170, %173 : vector<16x128xf32>
    %cst_152 = arith.constant 0.000000e+00 : f32
    %175 = vector.broadcast %cst_152 : f32 to vector<16x128xf32>
    %176 = arith.maximumf %174, %175 : vector<16x128xf32>
    %c1_153 = arith.constant 1 : index
    %c0_154 = arith.constant 0 : index
    %c0_155 = arith.constant 0 : index
    %177 = vector.load %arg4[%c1_153, %c0_154, %c0_155] : memref<3x16x16xf32, #tpu.memory_space<vmem>>, vector<1x16x16xf32>
    %178 = vector.shape_cast %177 : vector<1x16x16xf32> to vector<16x16xf32>
    %cst_156 = arith.constant dense<0.000000e+00> : vector<16x128xf32>
    %179 = tpu.matmul %178, %176, %cst_156 {dimension_numbers = #tpu.dot_dimension_numbers<[1], [0], [0], [1], [0, 0, 1, 1], [], []>} : vector<16x16xf32>, vector<16x128xf32>, vector<16x128xf32> -> vector<16x128xf32>
    %c1_157 = arith.constant 1 : index
    %c0_158 = arith.constant 0 : index
    %c0_159 = arith.constant 0 : index
    %180 = vector.load %arg5[%c1_157, %c0_158, %c0_159] : memref<3x16x1xf32, #tpu.memory_space<vmem>>, vector<1x16x1xf32>
    %181 = vector.shape_cast %180 : vector<1x16x1xf32> to vector<16x1xf32>
    %182 = vector.broadcast %181 : vector<16x1xf32> to vector<16x128xf32>
    %183 = arith.addf %179, %182 : vector<16x128xf32>
    %184 = arith.addf %183, %151 : vector<16x128xf32>
    %cst_160 = arith.constant 0.000000e+00 : f32
    %185 = vector.broadcast %cst_160 : f32 to vector<16x128xf32>
    %186 = arith.maximumf %184, %185 : vector<16x128xf32>
    %c1_i32_161 = arith.constant 1 : i32
    %187 = tpu.dynamic_rotate %186 by %c1_i32_161 dim 1 : vector<16x128xf32>, i32 -> vector<16x128xf32>
    %cst_162 = arith.constant 0.000000e+00 : f32
    %188 = vector.broadcast %cst_162 : f32 to vector<16x128xf32>
    %189 = arith.select %10, %187, %188 : vector<16x128xi1>, vector<16x128xf32>
    %c127_i32_163 = arith.constant 127 : i32
    %190 = tpu.dynamic_rotate %186 by %c127_i32_163 dim 1 : vector<16x128xf32>, i32 -> vector<16x128xf32>
    %cst_164 = arith.constant 0.000000e+00 : f32
    %191 = vector.broadcast %cst_164 : f32 to vector<16x128xf32>
    %192 = arith.select %12, %190, %191 : vector<16x128xi1>, vector<16x128xf32>
    %c2_165 = arith.constant 2 : index
    %c0_166 = arith.constant 0 : index
    %c0_167 = arith.constant 0 : index
    %c0_168 = arith.constant 0 : index
    %193 = vector.load %arg2[%c2_165, %c0_166, %c0_167, %c0_168] : memref<3x3x16x16xf32, #tpu.memory_space<vmem>>, vector<1x1x16x16xf32>
    %194 = vector.shape_cast %193 : vector<1x1x16x16xf32> to vector<16x16xf32>
    %cst_169 = arith.constant dense<0.000000e+00> : vector<16x128xf32>
    %195 = tpu.matmul %194, %189, %cst_169 {dimension_numbers = #tpu.dot_dimension_numbers<[1], [0], [0], [1], [0, 0, 1, 1], [], []>} : vector<16x16xf32>, vector<16x128xf32>, vector<16x128xf32> -> vector<16x128xf32>
    %c2_170 = arith.constant 2 : index
    %c1_171 = arith.constant 1 : index
    %c0_172 = arith.constant 0 : index
    %c0_173 = arith.constant 0 : index
    %196 = vector.load %arg2[%c2_170, %c1_171, %c0_172, %c0_173] : memref<3x3x16x16xf32, #tpu.memory_space<vmem>>, vector<1x1x16x16xf32>
    %197 = vector.shape_cast %196 : vector<1x1x16x16xf32> to vector<16x16xf32>
    %cst_174 = arith.constant dense<0.000000e+00> : vector<16x128xf32>
    %198 = tpu.matmul %197, %186, %cst_174 {dimension_numbers = #tpu.dot_dimension_numbers<[1], [0], [0], [1], [0, 0, 1, 1], [], []>} : vector<16x16xf32>, vector<16x128xf32>, vector<16x128xf32> -> vector<16x128xf32>
    %199 = arith.addf %195, %198 : vector<16x128xf32>
    %c2_175 = arith.constant 2 : index
    %c2_176 = arith.constant 2 : index
    %c0_177 = arith.constant 0 : index
    %c0_178 = arith.constant 0 : index
    %200 = vector.load %arg2[%c2_175, %c2_176, %c0_177, %c0_178] : memref<3x3x16x16xf32, #tpu.memory_space<vmem>>, vector<1x1x16x16xf32>
    %201 = vector.shape_cast %200 : vector<1x1x16x16xf32> to vector<16x16xf32>
    %cst_179 = arith.constant dense<0.000000e+00> : vector<16x128xf32>
    %202 = tpu.matmul %201, %192, %cst_179 {dimension_numbers = #tpu.dot_dimension_numbers<[1], [0], [0], [1], [0, 0, 1, 1], [], []>} : vector<16x16xf32>, vector<16x128xf32>, vector<16x128xf32> -> vector<16x128xf32>
    %203 = arith.addf %199, %202 : vector<16x128xf32>
    %c2_180 = arith.constant 2 : index
    %c0_181 = arith.constant 0 : index
    %c0_182 = arith.constant 0 : index
    %204 = vector.load %arg3[%c2_180, %c0_181, %c0_182] : memref<3x16x1xf32, #tpu.memory_space<vmem>>, vector<1x16x1xf32>
    %205 = vector.shape_cast %204 : vector<1x16x1xf32> to vector<16x1xf32>
    %206 = vector.broadcast %205 : vector<16x1xf32> to vector<16x128xf32>
    %207 = arith.addf %203, %206 : vector<16x128xf32>
    %cst_183 = arith.constant 0.000000e+00 : f32
    %208 = vector.broadcast %cst_183 : f32 to vector<16x128xf32>
    %209 = arith.maximumf %207, %208 : vector<16x128xf32>
    %c2_184 = arith.constant 2 : index
    %c0_185 = arith.constant 0 : index
    %c0_186 = arith.constant 0 : index
    %210 = vector.load %arg4[%c2_184, %c0_185, %c0_186] : memref<3x16x16xf32, #tpu.memory_space<vmem>>, vector<1x16x16xf32>
    %211 = vector.shape_cast %210 : vector<1x16x16xf32> to vector<16x16xf32>
    %cst_187 = arith.constant dense<0.000000e+00> : vector<16x128xf32>
    %212 = tpu.matmul %211, %209, %cst_187 {dimension_numbers = #tpu.dot_dimension_numbers<[1], [0], [0], [1], [0, 0, 1, 1], [], []>} : vector<16x16xf32>, vector<16x128xf32>, vector<16x128xf32> -> vector<16x128xf32>
    %c2_188 = arith.constant 2 : index
    %c0_189 = arith.constant 0 : index
    %c0_190 = arith.constant 0 : index
    %213 = vector.load %arg5[%c2_188, %c0_189, %c0_190] : memref<3x16x1xf32, #tpu.memory_space<vmem>>, vector<1x16x1xf32>
    %214 = vector.shape_cast %213 : vector<1x16x1xf32> to vector<16x1xf32>
    %215 = vector.broadcast %214 : vector<16x1xf32> to vector<16x128xf32>
    %216 = arith.addf %212, %215 : vector<16x128xf32>
    %217 = arith.addf %216, %184 : vector<16x128xf32>
    %c1_191 = arith.constant 1 : index
    %c0_192 = arith.constant 0 : index
    %c0_193 = arith.constant 0 : index
    %218 = vector.load %arg6[%c1_191, %c0_192, %c0_193] : memref<2x16x128xf32, #tpu.memory_space<vmem>>, vector<1x16x128xf32>
    %219 = vector.shape_cast %218 : vector<1x16x128xf32> to vector<16x128xf32>
    %220 = vector.shape_cast %217 : vector<16x128xf32> to vector<1x16x128xf32>
    tpu.vector_store %arg6[%c1_191, %c0_192, %c0_193], %220 {strides = array<i32>} : memref<2x16x128xf32, #tpu.memory_space<vmem>>, vector<1x16x128xf32>,
    return
  }
  func.func @transform_0(%arg0: i32) -> (i32, i32, i32) {
    %c0_i32 = arith.constant 0 : i32
    %c0_i32_0 = arith.constant 0 : i32
    %c0_i32_1 = arith.constant 0 : i32
    return %arg0, %c0_i32, %c0_i32_0 : i32, i32, i32
  }
  func.func @transform_1(%arg0: i32) -> (i32, i32, i32, i32) {
    %c0_i32 = arith.constant 0 : i32
    %c0_i32_0 = arith.constant 0 : i32
    %c0_i32_1 = arith.constant 0 : i32
    %c0_i32_2 = arith.constant 0 : i32
    %c0_i32_3 = arith.constant 0 : i32
    return %c0_i32, %c0_i32_0, %c0_i32_1, %c0_i32_2 : i32, i32, i32, i32
  }
  func.func @transform_2(%arg0: i32) -> (i32, i32, i32) {
    %c0_i32 = arith.constant 0 : i32
    %c0_i32_0 = arith.constant 0 : i32
    %c0_i32_1 = arith.constant 0 : i32
    %c0_i32_2 = arith.constant 0 : i32
    return %c0_i32, %c0_i32_0, %c0_i32_1 : i32, i32, i32
  }
  func.func @transform_3(%arg0: i32) -> (i32, i32, i32) {
    %c0_i32 = arith.constant 0 : i32
    %c0_i32_0 = arith.constant 0 : i32
    %c0_i32_1 = arith.constant 0 : i32
    %c0_i32_2 = arith.constant 0 : i32
    return %c0_i32, %c0_i32_0, %c0_i32_1 : i32, i32, i32
  }
  func.func @transform_4(%arg0: i32) -> (i32, i32, i32) {
    %c0_i32 = arith.constant 0 : i32
    %c0_i32_0 = arith.constant 0 : i32
    %c0_i32_1 = arith.constant 0 : i32
    %c0_i32_2 = arith.constant 0 : i32
    return %c0_i32, %c0_i32_0, %c0_i32_1 : i32, i32, i32
  }
  func.func @transform_5(%arg0: i32) -> (i32, i32, i32) {
    %c0_i32 = arith.constant 0 : i32
    %c0_i32_0 = arith.constant 0 : i32
    %c0_i32_1 = arith.constant 0 : i32
    return %arg0, %c0_i32, %c0_i32_0 : i32, i32, i32
  }
}

</mosaic_0001>

<bundles_post_ra>
// kernel: tpu_custom_call.1
= control target key start
LH: loop header
LB: loop body
LE: loop exit
PB: predicated region body
PF: predicated region fallthrough
CT: control target
= control target key end

     0   :  { %10 = vsyncpa [#allocation3], 0  ;;  %s1702_s0 = inlined_call_operand.vmem [shape: f32[2,16,128], index: 0, kind: input, shape index: {}]   ;;  %s1703_s1 = inlined_call_operand.hbm [shape: f32[3,3,16,16], index: 1, kind: input, shape index: {}]   ;;  %s1704_s2 = inlined_call_operand.vmem [shape: f32[3,16,1], index: 2, kind: input, shape index: {}]   ;;  %s1705_s3 = inlined_call_operand.vmem [shape: f32[3,16,16], index: 3, kind: input, shape index: {}]   ;;  %s1706_s4 = inlined_call_operand.vmem [shape: f32[3,16,1], index: 4, kind: input, shape index: {}]   ;;  %s1707_s5 = inlined_call_operand.hbm [shape: f32[2,16,128], index: 5, kind: output, shape index: {}]  }
   0x1   :  { %11 = vsyncpa [#allocation4], 0  ;;  %s18_s20 = sshll.u32 %s1703_s1, 4  ;;  %s1273_s21 = smov [#allocation2]   ;;  %s19_s20 = int_to_ptr.hbm [resolvable:$true] %s18_s20 }
   0x2   :  { %s20_s22 = sshll.u32 %s1273_s21, 4  ;;  %s1274_s23 = smov 128   ;;  %s21_s22 = int_to_ptr.vmem [resolvable:$true] %s20_s22 }
   0x3   :  { %s1275_s24 = smov 8  }
   0x4   :  { %26 = dma.hbm_to_vmem [thread:$0]  %s19_s20, 2304, %s21_s22, [#allocation3], %s1274_s23, %s1274_s23, %s1275_s24  }
   0x5   :  { %1269 = dma.done.wait [#allocation3], 2304  }
   0x6   :  { %1270 = vsyncadd [#allocation3], 4294964992  ;;  %v1323_v0 = vld [vmem:[%s1702_s0 + $0x8] sm:$0xff]  ;;  %v1329_v2 = vld [vmem:[%s1702_s0] sm:$0xff]  ;;  %s1276_s28 = smov 124   ;;  %s1277_s29 = smov 4   ;;  %v37_v8 = vlaneseq }
   0x7   :  { %v48_v1 = vmax.f32 %v1323_v0, 0.0  ;;  %v47_v3 = vmax.f32 %v1329_v2, 0.0  ;;  %vm66_vm0 = vcmask 130048   ;;  %v1336_v4 = vld [vmem:[#allocation2 + $0x10] sm:$0xff]  ;;  %v1340_v5 = vld [vmem:[#allocation2 + $0x18] sm:$0xff]  ;;  %v1345_v6 = vld [vmem:[%s1704_s2 + $0x8] sm:$0xff] }
   0x8   :  { %v1278_v7 = vmov 0   ;;  %v1353_v9 = vld [vmem:[%s1704_s2] sm:$0xff]  ;;  %v1355_v10 = vand.u32 127, %v37_v8  ;;  %v1376_v17 = vld [vmem:[#allocation2 + $0x28] sm:$0xff]  ;;  %s1279_s17 = smov 2   ;;  %s1280_s18 = smov 126  }
   0x9   :  { %57 = vrot.lane.b32.xlu0 %v48_v1, %s1276_s28  ;;  %51 = vrot.lane.b32.xlu1 %v48_v1, %s1277_s29  ;;  %v1364_v13 = vld [vmem:[#allocation2 + $0x20] sm:$0xff]  ;;  %v1378_v18 = vld [vmem:[#allocation2 + $0x8] sm:$0xff]  ;;  %v1423_v49 = vld [vmem:[%s1706_s4 + $0x18] sm:$0xff]  ;;  %s1281_s9 = smov 127   ;;  %s1282_s12 = smov 1  }
   0xa   :  { %87 = vmatpush.msra.mxu0 %v48_v1  ;;  %1218 = vset.pattern.permute.xlu2 %v1278_v7  ;;  %vm40_vm1 = vcmp.lt.s32.totalorder %v1355_v10, 124  ;;  %vm39_vm2 = vcmp.ge.s32.totalorder %v1355_v10, 4  ;;  %v1366_v14 = vld [vmem:[#allocation2] sm:$0xff]  ;;  %v1392_v22 = vld [vmem:[%s1706_s4 + $0x8] sm:$0xff]  ;;  %v1428_v50 = vld [vmem:[%s1704_s2 + $0x18] sm:$0xff]  ;;  %vm42_vm3 = vcmp.lt.s32.totalorder %v1355_v10, 126 }
   0xb   :  { %168 = vperm.xlu2 %1218, %v1345_v6   ;;  %1220 = vset.pattern.permute.xlu1 %v1278_v7  ;;  %v1387_v21 = vld [vmem:[%s1706_s4] sm:$0xff]  ;;  %v1406_v38 = vld [vmem:[%s1705_s3 + $0x8] sm:$0xff]  ;;  %v1436_v51 = vld [vmem:[%s1706_s4 + $0x10] sm:$0xff]  ;;  %vm41_vm4 = vcmp.ge.s32.totalorder %v1355_v10, 2  ;;  %vm44_vm5 = vcmp.lt.s32.totalorder %v1355_v10, 127  ;;  %vm43_vm6 = vcmp.ge.s32.totalorder %v1355_v10, 1 }
   0xc   :  { %88 = vmatpush.msra.mxu0 %v47_v3  ;;  %1219 = vset.pattern.permute.xlu0 %v1278_v7  ;;  %v1399_v37 = vld [vmem:[%s1705_s3] sm:$0xff]  ;;  %v1443_v52 = vld [vmem:[%s1704_s2 + $0x10] sm:$0xff]  ;;  %v1450_v54 = vld [vmem:[#allocation2 + $0x48] sm:$0xff]  ;;  %s1096_s1 = sshll.u32 %s1707_s5, 4  ;;  %s1097_s1 = int_to_ptr.hbm [resolvable:$true] %s1096_s1 }
   0xd   :  { %1109 = vmatmul.msk.f32.vlgmr.msra.gmra.mxu0 %vm66_vm0, %v1336_v4  ;;  %v1446_v53 = vld [vmem:[#allocation2 + $0x40] sm:$0xff]  ;;  %v1460_v57 = vld [vmem:[#allocation2 + $0x30] sm:$0xff]  ;;  %v1472_v61 = vld [vmem:[#allocation2 + $0x38] sm:$0xff] }
   0xe   :  { %v1462_v59 = vld [vmem:[#allocation2 + $0x50] sm:$0xff]  ;;  %v1474_v62 = vld [vmem:[#allocation2 + $0x58] sm:$0xff] }
  0x11   :  { %55 = vrot.lane.b32.xlu0 %v47_v3, %s1276_s28  ;;  %49 = vrot.lane.b32.xlu1 %v47_v3, %s1277_s29 }
  0x13   :  { %163 = vperm.xlu2 %1218, %v1353_v9  }
  0x15   :  { %1110 = vmatmul.msk.f32.gmra.mxu0 %vm66_vm0, %v1340_v5 }
  0x19   :  { %181 = vperm.xlu1 %1220, %v1387_v21   ;;  %186 = vperm.xlu0 %1219, %v1392_v22  }
  0x65   :  { %v169_v23 = vpop.permute.xlu2 %168 }
  0x6d   :  { %v164_v30 = vpop.permute.xlu2 %163 }
  0x7b   :  { %v58_v11 = vpop.permute.xlu0 %57  ;;  %v52_v12 = vpop.permute.xlu1 %51 }
  0x7c   :  { %1115 = vmatpush.msk.msra.mxu2 %vm40_vm1, %v58_v11  ;;  %1111 = vmatpush.msk.msra.mxu1 %vm39_vm2, %v52_v12 }
  0x83   :  { %v56_v15 = vpop.permute.xlu0 %55  ;;  %v50_v16 = vpop.permute.xlu1 %49 }
  0x84   :  { %1116 = vmatpush.msk.msra.mxu2 %vm40_vm1, %v56_v15  ;;  %1112 = vmatpush.msk.msra.mxu1 %vm39_vm2, %v50_v16 }
  0x85   :  { %1117 = vmatmul.msk.f32.vlgmr.msra.gmra.mxu2 %vm66_vm0, %v1364_v13  ;;  %1113 = vmatmul.msk.f32.vlgmr.msra.gmra.mxu1 %vm66_vm0, %v1366_v14 }
  0x8a   :  { %v90_v19 = vpop.f32.mrf.mxu0 }
  0x8b   :  { %v182_v39 = vpop.permute.xlu1 %181  ;;  %v187_v44 = vpop.permute.xlu0 %186 }
  0x8d   :  { %1118 = vmatmul.msk.f32.gmra.mxu2 %vm66_vm0, %v1376_v17  ;;  %1114 = vmatmul.msk.f32.gmra.mxu1 %vm66_vm0, %v1378_v18 }
  0x92   :  { %v93_v25 = vpop.f32.mrf.mxu0 }
 0x102   :  { %v119_v20 = vpop.f32.mrf.mxu1 }
 0x103   :  { %v120_v27 = vadd.f32 %v119_v20, %v90_v19 }
 0x108   :  { %v151_v24 = vpop.f32.mrf.mxu2 }
 0x109   :  { %v157_v29 = vadd.f32 %v151_v24, %v120_v27  ;;  %v1490_v27 = vld [vmem:[%s1705_s3 + $0x18] sm:$0xff] }
 0x10a   :  { %v122_v26 = vpop.f32.mrf.mxu1 }
 0x10b   :  { %v123_v28 = vadd.f32 %v122_v26, %v93_v25  ;;  %v171_v33 = vadd.f32 %v164_v30, %v157_v29  ;;  %v1483_v26 = vld [vmem:[%s1705_s3 + $0x10] sm:$0xff] }
 0x10d   :  { %v173_v36 = vmax.f32 %v171_v33, 0.0 }
 0x110   :  { %v154_v31 = vpop.f32.mrf.mxu2 }
 0x111   :  { %v158_v32 = vadd.f32 %v154_v31, %v123_v28 }
 0x113   :  { %v172_v34 = vadd.f32 %v169_v23, %v158_v32 }
 0x115   :  { %v174_v35 = vmax.f32 %v172_v34, 0.0 }
 0x117   :  { %209 = vmatpush.msra.mxu3 %v174_v35 }
 0x119   :  { %210 = vmatpush.msra.mxu3 %v173_v36  ;;  %v1502_v36 = vld [vmem:[%s1702_s0 + $0x18] sm:$0xff] }
 0x11a   :  { %1119 = vmatmul.msk.f32.vlgmr.msra.gmra.mxu3 %vm66_vm0, %v1399_v37 }
 0x122   :  { %1120 = vmatmul.msk.f32.gmra.mxu3 %vm66_vm0, %v1406_v38 }
 0x19d   :  { %v212_v40 = vpop.f32.mrf.mxu3 }
 0x19e   :  { %v213_v41 = vadd.f32 %v212_v40, %v182_v39  ;;  %v578_v40 = vmax.f32 %v1502_v36, 0.0 }
 0x1a0   :  { %v1411_v42 = vadd.f32 %v213_v41, %v1329_v2 }
 0x1a2   :  { %v220_v43 = vmax.f32 %v1411_v42, 0.0 }
 0x1a4   :  { %222 = vrot.lane.b32.xlu0 %v220_v43, %s1279_s17  ;;  %228 = vrot.lane.b32.xlu1 %v220_v43, %s1280_s18 }
 0x1a5   :  { %v215_v45 = vpop.f32.mrf.mxu3 }
 0x1a6   :  { %v216_v46 = vadd.f32 %v215_v45, %v187_v44  ;;  %v1524_v44 = vld [vmem:[%s1704_s2 + $0x28] sm:$0xff]  ;;  %v1532_v45 = vld [vmem:[%s1704_s2 + $0x20] sm:$0xff] }
 0x1a8   :  { %v1417_v47 = vadd.f32 %v216_v46, %v1323_v0  ;;  %v1538_v46 = vld [vmem:[#allocation2 + $0x70] sm:$0xff] }
 0x1aa   :  { %v221_v48 = vmax.f32 %v1417_v47, 0.0 }
 0x1ac   :  { %230 = vrot.lane.b32.xlu2 %v221_v48, %s1280_s18  ;;  %260 = vmatpush.msrb.mxu0 %v221_v48 }
 0x1ad   :  { %362 = vperm.xlu0 %1219, %v1423_v49   ;;  %342 = vperm.xlu1 %1220, %v1428_v50  }
 0x1ae   :  { %261 = vmatpush.msrb.mxu0 %v220_v43 }
 0x1af   :  { %1121 = vmatmul.msk.f32.vlgmr.msrb.gmra.mxu0 %vm66_vm0, %v1446_v53 }
 0x1b4   :  { %224 = vrot.lane.b32.xlu2 %v221_v48, %s1279_s17  ;;  %v1560_v48 = vld [vmem:[#allocation2 + $0x88] sm:$0xff] }
 0x1b5   :  { %357 = vperm.xlu1 %1220, %v1436_v51  }
 0x1b7   :  { %1122 = vmatmul.msk.f32.gmra.mxu0 %vm66_vm0, %v1450_v54 }
 0x1bc   :  { %337 = vperm.xlu2 %1218, %v1443_v52  }
 0x206   :  { %v231_v55 = vpop.permute.xlu2 %230 }
 0x207   :  { %1127 = vmatpush.msk.msrb.mxu2 %vm42_vm3, %v231_v55 }
 0x20e   :  { %v225_v56 = vpop.permute.xlu2 %224 }
 0x20f   :  { %1123 = vmatpush.msk.msrb.mxu1 %vm41_vm4, %v225_v56 }
 0x216   :  { %v223_v58 = vpop.permute.xlu0 %222  ;;  %v229_v60 = vpop.permute.xlu1 %228 }
 0x217   :  { %1124 = vmatpush.msk.msrb.mxu1 %vm41_vm4, %v223_v58  ;;  %1128 = vmatpush.msk.msrb.mxu2 %vm42_vm3, %v229_v60  ;;  %v338_v16 = vpop.permute.xlu2 %337 }
 0x218   :  { %1125 = vmatmul.msk.f32.vlgmr.msrb.gmra.mxu1 %vm66_vm0, %v1460_v57  ;;  %1129 = vmatmul.msk.f32.vlgmr.msrb.gmra.mxu2 %vm66_vm0, %v1462_v59 }
 0x21f   :  { %v343_v19 = vpop.permute.xlu1 %342  ;;  %v363_v33 = vpop.permute.xlu0 %362 }
 0x220   :  { %1126 = vmatmul.msk.f32.gmra.mxu1 %vm66_vm0, %v1472_v61  ;;  %1130 = vmatmul.msk.f32.gmra.mxu2 %vm66_vm0, %v1474_v62 }
 0x227   :  { %v358_v28 = vpop.permute.xlu1 %357 }
 0x22c   :  { %v263_v63 = vpop.f32.mrf.mxu0 }
 0x234   :  { %v266_v2 = vpop.f32.mrf.mxu0 }
 0x295   :  { %v292_v0 = vpop.f32.mrf.mxu1 }
 0x296   :  { %v293_v7 = vadd.f32 %v292_v0, %v263_v63  ;;  %v1576_v63 = vld [vmem:[#allocation2 + $0x68] sm:$0xff] }
 0x29b   :  { %v324_v1 = vpop.f32.mrf.mxu2 }
 0x29c   :  { %v330_v11 = vadd.f32 %v324_v1, %v293_v7 }
 0x29d   :  { %v295_v3 = vpop.f32.mrf.mxu1 }
 0x29e   :  { %v296_v8 = vadd.f32 %v295_v3, %v266_v2  ;;  %v345_v23 = vadd.f32 %v338_v16, %v330_v11 }
 0x2a0   :  { %v347_v25 = vmax.f32 %v345_v23, 0.0 }
 0x2a3   :  { %v327_v12 = vpop.f32.mrf.mxu2 }
 0x2a4   :  { %v331_v15 = vadd.f32 %v327_v12, %v296_v8 }
 0x2a6   :  { %v346_v20 = vadd.f32 %v343_v19, %v331_v15 }
 0x2a8   :  { %v348_v24 = vmax.f32 %v346_v20, 0.0 }
 0x2aa   :  { %385 = vmatpush.msrb.mxu3 %v348_v24 }
 0x2ac   :  { %386 = vmatpush.msrb.mxu3 %v347_v25 }
 0x2ad   :  { %1137 = vmatmul.msk.f32.vlgmr.msrb.gmra.mxu3 %vm66_vm0, %v1483_v26 }
 0x2b5   :  { %1138 = vmatmul.msk.f32.gmra.mxu3 %vm66_vm0, %v1490_v27 }
 0x330   :  { %v388_v29 = vpop.f32.mrf.mxu3 }
 0x331   :  { %v389_v30 = vadd.f32 %v388_v29, %v358_v28 }
 0x333   :  { %v1495_v31 = vadd.f32 %v389_v30, %v1411_v42  ;;  %v1515_v42 = vld [vmem:[%s1702_s0 + $0x10] sm:$0xff] }
 0x334   :  { %v577_v43 = vmax.f32 %v1515_v42, 0.0 }
 0x335   :  { %v396_v32 = vmax.f32 %v1495_v31, 0.0 }
 0x337   :  { %404 = vrot.lane.b32.xlu0 %v396_v32, %s1281_s9 }
 0x338   :  { %v391_v34 = vpop.f32.mrf.mxu3 }
 0x339   :  { %v392_v35 = vadd.f32 %v391_v34, %v363_v33 }
 0x33b   :  { %v1505_v39 = vadd.f32 %v392_v35, %v1417_v47  ;;  %v1545_v47 = vld [vmem:[#allocation2 + $0x78] sm:$0xff] }
 0x33d   :  { %v397_v41 = vmax.f32 %v1505_v39, 0.0 }
 0x33f   :  { %400 = vrot.lane.b32.xlu1 %v397_v41, %s1282_s12  ;;  %406 = vrot.lane.b32.xlu2 %v397_v41, %s1281_s9 }
 0x340   :  { %436 = vmatpush.msra.mxu0 %v397_v41  ;;  %587 = vrot.lane.b32.xlu0 %v578_v40, %s1276_s28 }
 0x342   :  { %437 = vmatpush.msra.mxu0 %v396_v32 }
 0x343   :  { %1139 = vmatmul.msk.f32.vlgmr.msra.gmra.mxu0 %vm66_vm0, %v1538_v46 }
 0x344   :  { %615 = vmatpush.msrb.mxu0 %v578_v40 }
 0x346   :  { %616 = vmatpush.msrb.mxu0 %v577_v43 }
 0x347   :  { %585 = vrot.lane.b32.xlu1 %v577_v43, %s1276_s28  ;;  %398 = vrot.lane.b32.xlu2 %v396_v32, %s1282_s12 }
 0x348   :  { %579 = vrot.lane.b32.xlu0 %v577_v43, %s1277_s29 }
 0x34b   :  { %1140 = vmatmul.msk.f32.gmra.mxu0 %vm66_vm0, %v1545_v47 }
 0x34f   :  { %518 = vperm.xlu1 %1220, %v1524_v44   ;;  %581 = vrot.lane.b32.xlu2 %v578_v40, %s1277_s29  ;;  %v1602_v40 = vld [vmem:[%s1705_s3 + $0x28] sm:$0xff] }
 0x350   :  { %695 = vperm.xlu0 %1219, %v1345_v6  }
 0x353   :  { %1159 = vmatmul.msk.f32.vlgmr.msrb.gmra.mxu0 %vm66_vm0, %v1336_v4  ;;  %v1564_v4 = vld [vmem:[#allocation2 + $0x60] sm:$0xff] }
 0x357   :  { %690 = vperm.xlu1 %1220, %v1353_v9   ;;  %513 = vperm.xlu2 %1218, %v1532_v45   ;;  %v1551_v9 = vld [vmem:[#allocation2 + $0x80] sm:$0xff] }
 0x358   :  { %708 = vperm.xlu0 %1219, %v1387_v21  }
 0x35b   :  { %1160 = vmatmul.msk.f32.gmra.mxu0 %vm66_vm0, %v1340_v5 }
 0x35f   :  { %713 = vperm.xlu2 %1218, %v1392_v22  }
 0x399   :  { %v407_v6 = vpop.permute.xlu2 %406 }
 0x39a   :  { %1145 = vmatpush.msk.msra.mxu2 %vm44_vm5, %v407_v6 }
 0x3a1   :  { %v399_v22 = vpop.permute.xlu2 %398 }
 0x3a9   :  { %v405_v21 = vpop.permute.xlu0 %404  ;;  %v582_v5 = vpop.permute.xlu2 %581 }
 0x3aa   :  { %1146 = vmatpush.msk.msra.mxu2 %vm44_vm5, %v405_v21 }
 0x3ab   :  { %1147 = vmatmul.msk.f32.vlgmr.msra.gmra.mxu2 %vm66_vm0, %v1551_v9 }
 0x3b1   :  { %v401_v55 = vpop.permute.xlu1 %400  ;;  %v514_v15 = vpop.permute.xlu2 %513 }
 0x3b2   :  { %v588_v56 = vpop.permute.xlu0 %587  ;;  %1141 = vmatpush.msk.msra.mxu1 %vm43_vm6, %v401_v55 }
 0x3b3   :  { %1148 = vmatmul.msk.f32.gmra.mxu2 %vm66_vm0, %v1560_v48 }
 0x3b4   :  { %1142 = vmatpush.msk.msra.mxu1 %vm43_vm6, %v399_v22  ;;  %1165 = vmatpush.msk.msrb.mxu2 %vm40_vm1, %v588_v56 }
 0x3b5   :  { %1143 = vmatmul.msk.f32.vlgmr.msra.gmra.mxu1 %vm66_vm0, %v1564_v4 }
 0x3b6   :  { %1161 = vmatpush.msk.msrb.mxu1 %vm39_vm2, %v582_v5 }
 0x3b9   :  { %v586_v58 = vpop.permute.xlu1 %585 }
 0x3ba   :  { %v580_v60 = vpop.permute.xlu0 %579  ;;  %1166 = vmatpush.msk.msrb.mxu2 %vm40_vm1, %v586_v58 }
 0x3bb   :  { %1167 = vmatmul.msk.f32.vlgmr.msrb.gmra.mxu2 %vm66_vm0, %v1364_v13  ;;  %1162 = vmatpush.msk.msrb.mxu1 %vm39_vm2, %v580_v60 }
 0x3bd   :  { %1144 = vmatmul.msk.f32.gmra.mxu1 %vm66_vm0, %v1576_v63 }
 0x3c0   :  { %v439_v0 = vpop.f32.mrf.mxu0 }
 0x3c1   :  { %v519_v19 = vpop.permute.xlu1 %518 }
 0x3c2   :  { %v696_v43 = vpop.permute.xlu0 %695 }
 0x3c3   :  { %1168 = vmatmul.msk.f32.gmra.mxu2 %vm66_vm0, %v1376_v17 }
 0x3c5   :  { %1163 = vmatmul.msk.f32.vlgmr.msrb.gmra.mxu1 %vm66_vm0, %v1366_v14 }
 0x3c8   :  { %v442_v3 = vpop.f32.mrf.mxu0 }
 0x3c9   :  { %v691_v6 = vpop.permute.xlu1 %690 }
 0x3ca   :  { %v709_v60 = vpop.permute.xlu0 %708 }
 0x3cd   :  { %1164 = vmatmul.msk.f32.gmra.mxu1 %vm66_vm0, %v1378_v18  ;;  %v1595_v18 = vld [vmem:[%s1705_s3 + $0x20] sm:$0xff] }
 0x3d0   :  { %v618_v20 = vpop.f32.mrf.mxu0 }
 0x3d8   :  { %v621_v30 = vpop.f32.mrf.mxu0 }
 0x42e   :  { %v500_v1 = vpop.f32.mrf.mxu2 }
 0x432   :  { %v468_v2 = vpop.f32.mrf.mxu1 }
 0x433   :  { %v469_v7 = vadd.f32 %v468_v2, %v439_v0 }
 0x435   :  { %v506_v11 = vadd.f32 %v500_v1, %v469_v7 }
 0x436   :  { %v503_v13 = vpop.f32.mrf.mxu2 }
 0x437   :  { %v521_v17 = vadd.f32 %v514_v15, %v506_v11 }
 0x439   :  { %v523_v28 = vmax.f32 %v521_v17, 0.0 }
 0x43a   :  { %v471_v8 = vpop.f32.mrf.mxu1 }
 0x43b   :  { %v472_v12 = vadd.f32 %v471_v8, %v442_v3 }
 0x43d   :  { %v507_v16 = vadd.f32 %v503_v13, %v472_v12  ;;  %v714_v13 = vpop.permute.xlu2 %713 }
 0x43e   :  { %v678_v24 = vpop.f32.mrf.mxu2 }
 0x43f   :  { %v522_v23 = vadd.f32 %v519_v19, %v507_v16 }
 0x441   :  { %v524_v14 = vmax.f32 %v522_v23, 0.0 }
 0x442   :  { %v647_v25 = vpop.f32.mrf.mxu1 }
 0x443   :  { %561 = vmatpush.msra.mxu3 %v524_v14  ;;  %v648_v29 = vadd.f32 %v647_v25, %v618_v20 }
 0x445   :  { %562 = vmatpush.msra.mxu3 %v523_v28  ;;  %v684_v34 = vadd.f32 %v678_v24, %v648_v29 }
 0x446   :  { %1155 = vmatmul.msk.f32.vlgmr.msra.gmra.mxu3 %vm66_vm0, %v1595_v18  ;;  %v681_v33 = vpop.f32.mrf.mxu2 }
 0x447   :  { %v698_v21 = vadd.f32 %v691_v6, %v684_v34 }
 0x449   :  { %v700_v56 = vmax.f32 %v698_v21, 0.0 }
 0x44a   :  { %v650_v32 = vpop.f32.mrf.mxu1 }
 0x44b   :  { %v651_v35 = vadd.f32 %v650_v32, %v621_v30 }
 0x44d   :  { %v685_v41 = vadd.f32 %v681_v33, %v651_v35 }
 0x44e   :  { %1156 = vmatmul.msk.f32.gmra.mxu3 %vm66_vm0, %v1602_v40 }
 0x44f   :  { %v699_v22 = vadd.f32 %v696_v43, %v685_v41 }
 0x451   :  { %v701_v55 = vmax.f32 %v699_v22, 0.0 }
 0x453   :  { %736 = vmatpush.msrb.mxu3 %v701_v55 }
 0x455   :  { %737 = vmatpush.msrb.mxu3 %v700_v56 }
 0x456   :  { %1169 = vmatmul.msk.f32.vlgmr.msrb.gmra.mxu3 %vm66_vm0, %v1399_v37 }
 0x45e   :  { %1170 = vmatmul.msk.f32.gmra.mxu3 %vm66_vm0, %v1406_v38 }
 0x4c9   :  { %v1610_v5 = vpop.f32.mrf.mxu3 }
 0x4d1   :  { %v1612_v58 = vpop.f32.mrf.mxu3 }
 0x4d9   :  { %v739_v0 = vpop.f32.mrf.mxu3 }
 0x4da   :  { %v740_v1 = vadd.f32 %v739_v0, %v709_v60 }
 0x4dc   :  { %v745_v2 = vadd.f32 %v1515_v42, %v740_v1 }
 0x4de   :  { %v747_v3 = vmax.f32 %v745_v2, 0.0 }
 0x4e0   :  { %755 = vrot.lane.b32.xlu2 %v747_v3, %s1280_s18 }
 0x4e1   :  { %v742_v7 = vpop.f32.mrf.mxu3 }
 0x4e2   :  { %v743_v8 = vadd.f32 %v742_v7, %v714_v13 }
 0x4e4   :  { %v746_v37 = vadd.f32 %v1502_v36, %v743_v8 }
 0x4e6   :  { %v748_v11 = vmax.f32 %v746_v37, 0.0 }
 0x4e8   :  { %751 = vrot.lane.b32.xlu0 %v748_v11, %s1279_s17  ;;  %757 = vrot.lane.b32.xlu1 %v748_v11, %s1280_s18 }
 0x4e9   :  { %785 = vmatpush.msra.mxu0 %v748_v11  ;;  %865 = vperm.xlu2 %1218, %v1428_v50  }
 0x4eb   :  { %786 = vmatpush.msra.mxu0 %v747_v3 }
 0x4ec   :  { %1171 = vmatmul.msk.f32.vlgmr.msra.gmra.mxu0 %vm66_vm0, %v1446_v53 }
 0x4f0   :  { %860 = vperm.xlu0 %1219, %v1443_v52   ;;  %749 = vrot.lane.b32.xlu1 %v747_v3, %s1279_s17 }
 0x4f1   :  { %878 = vperm.xlu2 %1218, %v1436_v51  }
 0x4f4   :  { %1172 = vmatmul.msk.f32.gmra.mxu0 %vm66_vm0, %v1450_v54 }
 0x4f8   :  { %883 = vperm.xlu1 %1220, %v1423_v49  }
 0x53a   :  { %v756_v50 = vpop.permute.xlu2 %755 }
 0x543   :  { %v866_v20 = vpop.permute.xlu2 %865 }
 0x55a   :  { %v752_v38 = vpop.permute.xlu0 %751  ;;  %v758_v36 = vpop.permute.xlu1 %757 }
 0x55b   :  { %1173 = vmatpush.msk.msra.mxu1 %vm41_vm4, %v752_v38  ;;  %1177 = vmatpush.msk.msra.mxu2 %vm42_vm3, %v758_v36 }
 0x55d   :  { %1178 = vmatpush.msk.msra.mxu2 %vm42_vm3, %v756_v50 }
 0x55e   :  { %1179 = vmatmul.msk.f32.vlgmr.msra.gmra.mxu2 %vm66_vm0, %v1462_v59 }
 0x562   :  { %v750_v51 = vpop.permute.xlu1 %749  ;;  %v861_v17 = vpop.permute.xlu0 %860 }
 0x563   :  { %1174 = vmatpush.msk.msra.mxu1 %vm41_vm4, %v750_v51 }
 0x564   :  { %1175 = vmatmul.msk.f32.vlgmr.msra.gmra.mxu1 %vm66_vm0, %v1460_v57 }
 0x566   :  { %1180 = vmatmul.msk.f32.gmra.mxu2 %vm66_vm0, %v1474_v62 }
 0x569   :  { %v788_v49 = vpop.f32.mrf.mxu0 }
 0x56a   :  { %v884_v30 = vpop.permute.xlu1 %883 }
 0x56c   :  { %1176 = vmatmul.msk.f32.gmra.mxu1 %vm66_vm0, %v1472_v61  ;;  %v879_v61 = vpop.permute.xlu2 %878 }
 0x571   :  { %v791_v42 = vpop.f32.mrf.mxu0 }
 0x5e1   :  { %v817_v52 = vpop.f32.mrf.mxu1  ;;  %v848_v53 = vpop.f32.mrf.mxu2 }
 0x5e2   :  { %v818_v54 = vadd.f32 %v817_v52, %v788_v49 }
 0x5e4   :  { %v854_v15 = vadd.f32 %v848_v53, %v818_v54 }
 0x5e6   :  { %v868_v23 = vadd.f32 %v861_v17, %v854_v15 }
 0x5e8   :  { %v870_v14 = vmax.f32 %v868_v23, 0.0 }
 0x5e9   :  { %v820_v12 = vpop.f32.mrf.mxu1  ;;  %v851_v59 = vpop.f32.mrf.mxu2 }
 0x5ea   :  { %v821_v16 = vadd.f32 %v820_v12, %v791_v42 }
 0x5ec   :  { %v855_v19 = vadd.f32 %v851_v59, %v821_v16 }
 0x5ee   :  { %v869_v57 = vadd.f32 %v866_v20, %v855_v19 }
 0x5f0   :  { %v871_v24 = vmax.f32 %v869_v57, 0.0 }
 0x5f2   :  { %906 = vmatpush.msra.mxu3 %v871_v24 }
 0x5f4   :  { %907 = vmatpush.msra.mxu3 %v870_v14 }
 0x5f5   :  { %1187 = vmatmul.msk.f32.vlgmr.msra.gmra.mxu3 %vm66_vm0, %v1483_v26  ;;  %v1154_v26 = vld [vmem:[%s1706_s4 + $0x28] sm:$0xff] }
 0x5fd   :  { %1188 = vmatmul.msk.f32.gmra.mxu3 %vm66_vm0, %v1490_v27  ;;  %v1203_v27 = vld [vmem:[%s1706_s4 + $0x20] sm:$0xff]  ;;  %s1283_s4 = smov [#allocation5]  }
 0x5fe   :  { %s1094_s22 = sshll.u32 %s1283_s4, 4  ;;  %s1095_s22 = int_to_ptr.vmem [resolvable:$true] %s1094_s22 }
 0x678   :  { %v909_v62 = vpop.f32.mrf.mxu3 }
 0x679   :  { %v910_v25 = vadd.f32 %v909_v62, %v879_v61 }
 0x67b   :  { %v1648_v28 = vadd.f32 %v910_v25, %v745_v2 }
 0x67d   :  { %v917_v29 = vmax.f32 %v1648_v28, 0.0 }
 0x67f   :  { %925 = vrot.lane.b32.xlu1 %v917_v29, %s1281_s9 }
 0x680   :  { %v912_v32 = vpop.f32.mrf.mxu3 }
 0x681   :  { %v913_v33 = vadd.f32 %v912_v32, %v884_v30 }
 0x683   :  { %v1652_v34 = vadd.f32 %v913_v33, %v746_v37 }
 0x685   :  { %v918_v35 = vmax.f32 %v1652_v34, 0.0 }
 0x687   :  { %921 = vrot.lane.b32.xlu2 %v918_v35, %s1282_s12  ;;  %927 = vrot.lane.b32.xlu0 %v918_v35, %s1281_s9 }
 0x688   :  { %955 = vmatpush.msrb.mxu0 %v918_v35  ;;  %1035 = vperm.xlu1 %1220, %v1524_v44  }
 0x68a   :  { %956 = vmatpush.msrb.mxu0 %v917_v29 }
 0x68b   :  { %1189 = vmatmul.msk.f32.vlgmr.msrb.gmra.mxu0 %vm66_vm0, %v1538_v46 }
 0x68f   :  { %1030 = vperm.xlu2 %1218, %v1532_v45   ;;  %919 = vrot.lane.b32.xlu0 %v917_v29, %s1282_s12 }
 0x690   :  { %538 = vperm.xlu1 %1220, %v1154_v26  }
 0x693   :  { %1190 = vmatmul.msk.f32.gmra.mxu0 %vm66_vm0, %v1545_v47 }
 0x697   :  { %1048 = vperm.xlu2 %1218, %v1203_v27   ;;  %533 = vperm.xlu0 %1219, %v1203_v27  }
 0x69f   :  { %1053 = vperm.xlu0 %1219, %v1154_v26  }
 0x6e1   :  { %v922_v44 = vpop.permute.xlu2 %921 }
 0x6e2   :  { %1191 = vmatpush.msk.msrb.mxu1 %vm43_vm6, %v922_v44 }
 0x6e9   :  { %v1031_v3 = vpop.permute.xlu2 %1030 }
 0x6f1   :  { %v926_v46 = vpop.permute.xlu1 %925 }
 0x6f9   :  { %v928_v41 = vpop.permute.xlu0 %927 }
 0x6fa   :  { %v1036_v45 = vpop.permute.xlu1 %1035  ;;  %1195 = vmatpush.msk.msrb.mxu2 %vm44_vm5, %v928_v41 }
 0x6fc   :  { %1196 = vmatpush.msk.msrb.mxu2 %vm44_vm5, %v926_v46 }
 0x6fd   :  { %1197 = vmatmul.msk.f32.vlgmr.msrb.gmra.mxu2 %vm66_vm0, %v1551_v9 }
 0x701   :  { %v920_v47 = vpop.permute.xlu0 %919 }
 0x702   :  { %v539_v43 = vpop.permute.xlu1 %538  ;;  %1192 = vmatpush.msk.msrb.mxu1 %vm43_vm6, %v920_v47 }
 0x703   :  { %v568_v6 = vadd.f32 %v1612_v58, %v539_v43  ;;  %1193 = vmatmul.msk.f32.vlgmr.msrb.gmra.mxu1 %vm66_vm0, %v1564_v4 }
 0x705   :  { %v571_v21 = vadd.f32 %v568_v6, %v1505_v39  ;;  %1198 = vmatmul.msk.f32.gmra.mxu2 %vm66_vm0, %v1560_v48 }
 0x707   :  { %573 = vst [vmem:[#allocation5 + $0x8] sm:$0xff] %v571_v21 }
 0x708   :  { %v958_v9 = vpop.f32.mrf.mxu0 }
 0x709   :  { %v534_v22 = vpop.permute.xlu0 %533 }
 0x70a   :  { %v565_v55 = vadd.f32 %v1610_v5, %v534_v22 }
 0x70b   :  { %1194 = vmatmul.msk.f32.gmra.mxu1 %vm66_vm0, %v1576_v63 }
 0x70c   :  { %v570_v10 = vadd.f32 %v565_v55, %v1495_v31  ;;  %v1049_v31 = vpop.permute.xlu2 %1048 }
 0x70e   :  { %572 = vst [vmem:[#allocation5] sm:$0xff] %v570_v10 }
 0x710   :  { %v961_v4 = vpop.f32.mrf.mxu0 }
 0x711   :  { %v1054_v38 = vpop.permute.xlu0 %1053 }
 0x780   :  { %v987_v56 = vpop.f32.mrf.mxu1  ;;  %v1018_v58 = vpop.f32.mrf.mxu2 }
 0x781   :  { %v988_v60 = vadd.f32 %v987_v56, %v958_v9 }
 0x783   :  { %v1024_v1 = vadd.f32 %v1018_v58, %v988_v60 }
 0x785   :  { %v1038_v13 = vadd.f32 %v1031_v3, %v1024_v1 }
 0x787   :  { %v1040_v8 = vmax.f32 %v1038_v13, 0.0 }
 0x788   :  { %v990_v0 = vpop.f32.mrf.mxu1  ;;  %v1021_v39 = vpop.f32.mrf.mxu2 }
 0x789   :  { %v991_v2 = vadd.f32 %v990_v0, %v961_v4 }
 0x78b   :  { %v1025_v48 = vadd.f32 %v1021_v39, %v991_v2 }
 0x78d   :  { %v1039_v7 = vadd.f32 %v1036_v45, %v1025_v48 }
 0x78f   :  { %v1041_v5 = vmax.f32 %v1039_v7, 0.0 }
 0x791   :  { %1076 = vmatpush.msrb.mxu3 %v1041_v5 }
 0x793   :  { %1077 = vmatpush.msrb.mxu3 %v1040_v8 }
 0x794   :  { %1205 = vmatmul.msk.f32.vlgmr.msrb.gmra.mxu3 %vm66_vm0, %v1595_v18 }
 0x79c   :  { %1206 = vmatmul.msk.f32.gmra.mxu3 %vm66_vm0, %v1602_v40 }
 0x817   :  { %v1079_v63 = vpop.f32.mrf.mxu3 }
 0x818   :  { %v1080_v37 = vadd.f32 %v1079_v63, %v1049_v31 }
 0x81a   :  { %v1085_v11 = vadd.f32 %v1080_v37, %v1648_v28 }
 0x81c   :  { %1088 = vst [vmem:[#allocation5 + $0x10] sm:$0xff] %v1085_v11 }
 0x81f   :  { %v1082_v36 = vpop.f32.mrf.mxu3 }
 0x820   :  { %v1083_v50 = vadd.f32 %v1082_v36, %v1054_v38 }
 0x822   :  { %v1086_v18 = vadd.f32 %v1083_v50, %v1652_v34 }
 0x824   :  { %1089 = vst [vmem:[#allocation5 + $0x18] sm:$0xff] %v1086_v18 }
 0x825   :  { %1102 = dma.vmem_to_hbm [thread:$0]  %s1095_s22, 512, %s1097_s1, [#allocation4], %s1274_s23, %s1274_s23, %s1275_s24  }
 0x826   :  { %1271 = dma.done.wait [#allocation4], 512  }
 0x827   :  { %1272 = vsyncadd [#allocation4], 4294966784 }
 0x828   :  { %1107 = vsyncpa [#allocation3], 1 }
 0x829   :  { %1108 = vsyncpa [#allocation4], 1 }

</bundles_post_ra>
